<compile_context>
chip_gen: v6e
topology: v6e:2x2x1
jax: 0.10.0
libtpu: 0.0.40
codegen_flags: <defaults>
</compile_context>

<pallas_src>
import functools

import jax
import jax.numpy as jnp
from jax.experimental import pallas as pl
from jax.experimental.pallas import tpu as pltpu


def _rmsnorm_kernel(x_ref, w_ref, o_ref, *, eps, exact_rounding):
    # x_ref: (tm, D) input tile; w_ref: (1, D) f32 weight; o_ref: (tm, D) output.
    # Pass 1: mean of squares in f32 (lane-axis reduction).
    xf = x_ref[...].astype(jnp.float32)
    ms = jnp.mean(xf * xf, axis=-1, keepdims=True)
    inv = jax.lax.rsqrt(ms + eps)
    # Pass 2: re-read the input tile (already resident in VMEM) so the full f32
    # copy does not stay live across the reduction (less vreg/VMEM pressure).
    xn = x_ref[...].astype(jnp.float32) * inv
    if exact_rounding and x_ref.dtype != jnp.float32:
        # torch `.type_as(x)`: round to x.dtype before the f32 weight multiply.
        xn = xn.astype(x_ref.dtype).astype(jnp.float32)
    o_ref[...] = (w_ref[...].astype(jnp.float32) * xn).astype(o_ref.dtype)


def _num_tensorcores_per_chip() -> int:
    """Best-effort detection of TensorCores per chip (v7x = 2); default 1."""
    try:
        info = pltpu.get_tpu_info()
        for name in ("num_cores", "num_tensorcores", "tensorcore_count",
                     "cores_per_chip"):
            v = getattr(info, name, None)
            if isinstance(v, int) and v > 1:
                return v
    except Exception:
        pass
    return 1


def rmsnorm(x, weight, eps: float, *, block_rows: int | None = None,
            out_dtype=None, max_block_rows: int = 512,
            exact_torch_rounding: bool = True,
            vmem_budget_bytes: int = 32 << 20):
    """RMSNorm over the last axis of x, matching the PyTorch module.

    out_dtype=None keeps strict torch promotion (f32 weight * normed -> f32
    output). For bf16 inputs, pass out_dtype=x.dtype for ~1.5x less HBM
    writeback (recommended perf default when torch bit-parity is not needed).
    """
    orig_shape = x.shape
    dim = orig_shape[-1]
    assert weight.shape == (dim,)

    if out_dtype is None:
        # torch promotion: weight (f32) * normed (x.dtype) -> f32
        out_dtype = jnp.promote_types(jnp.float32, x.dtype)

    x2d = x.reshape(-1, dim)
    rows = x2d.shape[0]

    in_bytes = jnp.dtype(x.dtype).itemsize
    out_bytes = jnp.dtype(out_dtype).itemsize
    # Row alignment = sublane packing of the input dtype (8 f32, 16 bf16, 32 i8/fp8).
    row_align = 8 * max(1, 4 // max(1, in_bytes))

    # Per-row VMEM footprint: double-buffered in/out tiles + ~3 f32 temporaries.
    per_row = dim * (2 * in_bytes + 2 * out_bytes + 3 * 4)

    if block_rows is None:
        tm = int(vmem_budget_bytes // per_row)
        tm = max(row_align, min((tm // row_align) * row_align, max_block_rows))
    else:
        tm = max(row_align, (int(block_rows) // row_align) * row_align)
    # Never use a tile larger than the (alignment-rounded) row count.
    tm = min(tm, ((rows + row_align - 1) // row_align) * row_align)
    tm = max(tm, row_align)

    # No pre-padding: Pallas pads reads / masks writes for the last partial block.
    grid = pl.cdiv(rows, tm)

    w2d = weight.reshape(1, dim).astype(jnp.float32)

    # Explicit VMEM limit sized to the actual footprint (+ generous slack for
    # Mosaic internal scratch), clamped below v7x's 64 MiB physical VMEM.
    vmem_limit = tm * per_row + 2 * dim * 4 + (8 << 20)
    vmem_limit = int(min(max(vmem_limit, 16 << 20), 60 << 20))

    cost = pl.CostEstimate(
        flops=3 * rows * dim,          # square, scale, weight multiply
        transcendentals=rows,          # one rsqrt per row
        bytes_accessed=rows * dim * (in_bytes + out_bytes) + dim * 4,
    )

    # Engage both TensorCores on multi-TC chips (v7x); PARALLEL is the safe
    # (and equivalent) fallback on single-TC chips.
    row_sem = (pltpu.CORE_PARALLEL if _num_tensorcores_per_chip() > 1
               else pltpu.PARALLEL)

    kernel = functools.partial(_rmsnorm_kernel, eps=float(eps),
                               exact_rounding=exact_torch_rounding)

    out2d = pl.pallas_call(
        kernel,
        out_shape=jax.ShapeDtypeStruct((rows, dim), out_dtype),
        grid_spec=pltpu.PrefetchScalarGridSpec(
            num_scalar_prefetch=0,
            grid=(grid,),
            in_specs=[
                pl.BlockSpec((tm, dim), lambda i: (i, 0)),
                pl.BlockSpec((1, dim), lambda i: (0, 0)),
            ],
            out_specs=pl.BlockSpec((tm, dim), lambda i: (i, 0)),
        ),
        compiler_params=pltpu.CompilerParams(
            dimension_semantics=(row_sem,),
            vmem_limit_bytes=vmem_limit,
        ),
        cost_estimate=cost,
    )(x2d, w2d)

    return out2d.reshape(orig_shape)


def rmsnorm_ref(x, weight, eps: float):
    xf = x.astype(jnp.float32)
    inv = jax.lax.rsqrt(jnp.mean(xf * xf, axis=-1, keepdims=True) + eps)
    return weight.astype(jnp.float32) * (xf * inv).astype(x.dtype).astype(jnp.float32)


if __name__ == "__main__":
    key = jax.random.PRNGKey(0)
    eps = 1e-6
    hidden = 128
    weight = jnp.ones((hidden,), dtype=jnp.float32)  # module init: torch.ones(dim)

    # Case 1: standard shape.
    x = jax.random.normal(key, (2, 8, hidden), dtype=jnp.float32)
    out = jax.block_until_ready(rmsnorm(x, weight, eps))
    ref = rmsnorm_ref(x, weight, eps)
    assert out.shape == x.shape
    assert jnp.allclose(out, ref, atol=1e-5, rtol=1e-5)

    # Case 2: ragged row count (exercises the masked partial last block, no pad).
    x2 = jax.random.normal(jax.random.PRNGKey(1), (3, 5, hidden), dtype=jnp.float32)
    out2 = jax.block_until_ready(rmsnorm(x2, weight, eps))
    ref2 = rmsnorm_ref(x2, weight, eps)
    assert out2.shape == x2.shape
    assert jnp.allclose(out2, ref2, atol=1e-5, rtol=1e-5)

    # Case 3: multi-step grid with a partial final block (explicit block_rows).
    x3 = jax.random.normal(jax.random.PRNGKey(2), (3, 40, hidden), dtype=jnp.float32)
    out3 = jax.block_until_ready(rmsnorm(x3, weight, eps, block_rows=64))
    ref3 = rmsnorm_ref(x3, weight, eps)
    assert jnp.allclose(out3, ref3, atol=1e-5, rtol=1e-5)

    # Case 4: bf16 input (16-row sublane alignment path), strict torch rounding.
    x4 = jax.random.normal(jax.random.PRNGKey(3), (2, 8, hidden), dtype=jnp.bfloat16)
    out4 = jax.block_until_ready(rmsnorm(x4, weight, eps))
    ref4 = rmsnorm_ref(x4, weight, eps)
    assert out4.dtype == jnp.float32
    assert jnp.allclose(out4, ref4, atol=1e-2, rtol=1e-2)

    print("KERNEL_OK")
</pallas_src>

<mosaic_0001>
module attributes {stable_mosaic.version = 11 : i64} {
  func.func @_rmsnorm_kernel(%arg0: i32, %arg1: memref<16x128xf32, #tpu.memory_space<vmem>>, %arg2: memref<1x128xf32, #tpu.memory_space<vmem>>, %arg3: memref<16x128xf32, #tpu.memory_space<vmem>>) attributes {dimension_semantics = [#tpu.dimension_semantics<parallel>], iteration_bounds = array<i64: 1>, scalar_prefetch = 0 : i64, scratch_operands = 0 : i64, tpu.core_type = #tpu.core_type<tc>, window_params = [{transform_indices = @transform_0, window_bounds = array<i64: 16, 128>}, {pipeline_mode = #tpu.pipeline_mode<synchronous>, transform_indices = @transform_1, window_bounds = array<i64: 1, 128>}, {transform_indices = @transform_2, window_bounds = array<i64: 16, 128>}]} {
    %c0 = arith.constant 0 : index
    %c0_0 = arith.constant 0 : index
    %0 = vector.load %arg1[%c0, %c0_0] : memref<16x128xf32, #tpu.memory_space<vmem>>, vector<16x128xf32>
    %1 = arith.mulf %0, %0 : vector<16x128xf32>
    %cst = arith.constant dense<0.000000e+00> : vector<16xf32>
    %2 = vector.multi_reduction <add>, %1, %cst [1] : vector<16x128xf32> to vector<16xf32>
    %3 = vector.shape_cast %2 : vector<16xf32> to vector<16x1xf32>
    %cst_1 = arith.constant 1.280000e+02 : f32
    %4 = vector.broadcast %cst_1 : f32 to vector<16x1xf32>
    %5 = arith.divf %3, %4 : vector<16x1xf32>
    %cst_2 = arith.constant 9.99999997E-7 : f32
    %6 = vector.broadcast %cst_2 : f32 to vector<16x1xf32>
    %7 = arith.addf %5, %6 : vector<16x1xf32>
    %8 = math.rsqrt %7 : vector<16x1xf32>
    %c0_3 = arith.constant 0 : index
    %c0_4 = arith.constant 0 : index
    %9 = vector.load %arg1[%c0_3, %c0_4] : memref<16x128xf32, #tpu.memory_space<vmem>>, vector<16x128xf32>
    %10 = vector.broadcast %8 : vector<16x1xf32> to vector<16x128xf32>
    %11 = arith.mulf %9, %10 : vector<16x128xf32>
    %c0_5 = arith.constant 0 : index
    %c0_6 = arith.constant 0 : index
    %12 = vector.load %arg2[%c0_5, %c0_6] : memref<1x128xf32, #tpu.memory_space<vmem>>, vector<1x128xf32>
    %13 = vector.broadcast %12 : vector<1x128xf32> to vector<16x128xf32>
    %14 = arith.mulf %13, %11 : vector<16x128xf32>
    %c0_7 = arith.constant 0 : index
    %c0_8 = arith.constant 0 : index
    %15 = vector.load %arg3[%c0_7, %c0_8] : memref<16x128xf32, #tpu.memory_space<vmem>>, vector<16x128xf32>
    tpu.vector_store %arg3[%c0_7, %c0_8], %14 {strides = array<i32>} : memref<16x128xf32, #tpu.memory_space<vmem>>, vector<16x128xf32>,
    return
  }
  func.func @transform_0(%arg0: i32) -> (i32, i32) {
    %c0_i32 = arith.constant 0 : i32
    %c0_i32_0 = arith.constant 0 : i32
    return %arg0, %c0_i32 : i32, i32
  }
  func.func @transform_1(%arg0: i32) -> (i32, i32) {
    %c0_i32 = arith.constant 0 : i32
    %c0_i32_0 = arith.constant 0 : i32
    %c0_i32_1 = arith.constant 0 : i32
    return %c0_i32, %c0_i32_0 : i32, i32
  }
  func.func @transform_2(%arg0: i32) -> (i32, i32) {
    %c0_i32 = arith.constant 0 : i32
    %c0_i32_0 = arith.constant 0 : i32
    return %arg0, %c0_i32 : i32, i32
  }
}

</mosaic_0001>

<bundles_post_ra>
// kernel: tpu_custom_call.1
= control target key start
LH: loop header
LB: loop body
LE: loop exit
PB: predicated region body
PF: predicated region fallthrough
CT: control target
= control target key end

     0   :  { %7 = vsyncpa [#allocation3], 0  ;;  %s158_s0 = inlined_call_operand.hbm [shape: f32[16,128], index: 0, kind: input, shape index: {}]   ;;  %s159_s1 = inlined_call_operand.vmem [shape: f32[1,128], index: 1, kind: input, shape index: {}]   ;;  %s160_s2 = inlined_call_operand.hbm [shape: f32[16,128], index: 2, kind: output, shape index: {}]  }
   0x1   :  { %8 = vsyncpa [#allocation4], 0  ;;  %s124_s9 = smov [#allocation2]  }
   0x2   :  { %s14_s10 = sshll.u32 %s124_s9, 4  ;;  %s15_s10 = int_to_ptr.vmem [resolvable:$true] %s14_s10 }
   0x3   :  { %s88_s11 = scalar_lea.vmem %s15_s10, 256  ;;  %p93_p1 = scmp.lt.s32.totalorder %s15_s10, %s15_s10 }
   0x4   :  { %p89_p0 = scmp.ne.s32.totalorder %s15_s10, %s88_s11  ;;  %p94_p2 = scmp.lt.s32.totalorder %s88_s11, %s88_s11 }
   0x6   :  { %p95_p3 = por %p94_p2, %p93_p1 }
   0x8   :  { %p96_p4 = pnand %p95_p3, %p89_p0 }
   0xa   :  { %99 = shalt.err (!%p96_p4)
}
   0xb   :  { %s125_s12 = smov 128   ;;  %s126_s13 = smov 8  }
   0xc   :  { %20 = dma.hbm_to_vmem [thread:$0]  %s158_s0, 256, %s15_s10, [#allocation3], %s125_s12, %s125_s12, %s126_s13  }
   0xd   :  { %120 = dma.done.wait [#allocation3], 256  }
   0xe   :  { %121 = vsyncadd [#allocation3], 4294967040  ;;  %v26_v0 = vld [vmem:[#allocation2] sm:$0xff]  ;;  %v27_v1 = vld [vmem:[#allocation2 + $0x8] sm:$0xff]  ;;  %s127_s0 = smov [#allocation5]  }
   0xf   :  { %v28_v2 = vmul.f32 %v26_v0, %v26_v0  ;;  %v29_v3 = vmul.f32 %v27_v1, %v27_v1  ;;  %v71_v11 = vld [vmem:[%s159_s1] ss:$0 sm:$0xff]  ;;  %s59_s18 = sshll.u32 %s127_s0, 4  ;;  %s60_s18 = int_to_ptr.vmem [resolvable:$true] %s59_s18 }
  0x10   :  { %s100_s19 = scalar_lea.vmem %s60_s18, 256  ;;  %p105_p6 = scmp.lt.s32.totalorder %s60_s18, %s60_s18 }
  0x11   :  { %30 = vadd.xlane.f32.xlu0 %v28_v2  ;;  %p101_p5 = scmp.ne.s32.totalorder %s60_s18, %s100_s19  ;;  %p106_p7 = scmp.lt.s32.totalorder %s100_s19, %s100_s19 }
  0x13   :  { %p107_p8 = por %p106_p7, %p105_p6 }
  0x15   :  { %32 = vadd.xlane.f32.xlu0 %v29_v3  ;;  %p108_p9 = pnand %p107_p8, %p101_p5 }
  0x9a   :  { %v31_v4 = vpop.xlane.xlu0 %30 }
  0x9b   :  { %v35_v5 = vmul.f32 0.0078125, %v31_v4 }
  0x9d   :  { %v37_v6 = vadd.f32 1e-06, %v35_v5 }
  0x9e   :  { %v33_v7 = vpop.xlane.xlu0 %32 }
  0x9f   :  { %76 = vrsqrt.f32 %v37_v6  ;;  %v36_v8 = vmul.f32 0.0078125, %v33_v7 }
  0xa1   :  { %v38_v9 = vadd.f32 1e-06, %v36_v8 }
  0xa3   :  { %78 = vrsqrt.f32 %v38_v9 }
  0xac   :  { %v77_v10 = vpop.eup %76 }
  0xad   :  { %v41_v12 = vmul.f32 %v77_v10, %v26_v0 }
  0xaf   :  { %v50_v13 = vmul.f32 %v71_v11, %v41_v12 }
  0xb0   :  { %v79_v14 = vpop.eup %78 }
  0xb1   :  { %v42_v15 = vmul.f32 %v79_v14, %v27_v1  ;;  %52 = vst [vmem:[#allocation5] sm:$0xff] %v50_v13 }
  0xb3   :  { %v51_v16 = vmul.f32 %v71_v11, %v42_v15 }
  0xb5   :  { %53 = vst [vmem:[#allocation5 + $0x8] sm:$0xff] %v51_v16 }
  0xb6   :  { %111 = shalt.err (!%p108_p9)
}
  0xb7   :  { %65 = dma.vmem_to_hbm [thread:$0]  %s60_s18, 256, %s160_s2, [#allocation4], %s125_s12, %s125_s12, %s126_s13  }
  0xb8   :  { %122 = dma.done.wait [#allocation4], 256  }
  0xb9   :  { %123 = vsyncadd [#allocation4], 4294967040 }
  0xba   :  { %69 = vsyncpa [#allocation3], 1 }
  0xbb   :  { %70 = vsyncpa [#allocation4], 1 }

</bundles_post_ra>
